<compile_context>
chip_gen: v7x
topology: tpu7x:2x2x1
jax: 0.10.0
libtpu: 0.0.40
codegen_flags: <defaults>
</compile_context>

<pallas_src>
import jax
import jax.numpy as jnp
from jax.experimental import pallas as pl
from jax.experimental.pallas import tpu as pltpu

LANE = 128
SUB = 8


def _round_up(n, m):
    return ((n + m - 1) // m) * m


# ----------------------------------------------------------------------------
# One-time parameter packing: single lane-dense f32 slab.
# Block order (row offsets are multiples of 8):
#   0: w1   (in_rows, 128)   rows >= state_dim are zero
#   1: b1   (8, 128)         row 0 is the bias
#   2: w2   (128, 128)
#   3: b2   (8, 128)
#   4: wah  (128, 128)       cols >= 16 are zero
#   5: bah  (8, 128)         cols >= 16 are zero
#   6: wheads = [wao | wvo]  (128, 128)  rows >= 16 and cols >= action_num+1 zero
#   7: bheads = [bao | bvo]  (8, 128)
# ----------------------------------------------------------------------------
def pack_params(p):
    state_dim, h1 = p["w1"].shape
    h2 = p["w2"].shape[1]
    nh = p["wah"].shape[1]
    action_num = p["wao"].shape[1]
    in_rows = _round_up(max(state_dim, 1), SUB)

    def pad2(a, rows, cols):
        r, c = a.shape
        return jnp.pad(a, ((0, rows - r), (0, cols - c)))

    # Fuse the two heads once, at init time (not per call).
    w_heads = jnp.concatenate([p["wao"], p["wvo"]], axis=1)   # (nh, action_num+1)
    b_heads = jnp.concatenate([p["bao"], p["bvo"]], axis=1)   # (1, action_num+1)

    blocks = [
        pad2(p["w1"], in_rows, LANE),
        pad2(p["b1"], SUB, LANE),
        pad2(p["w2"], _round_up(h1, SUB), LANE),
        pad2(p["b2"], SUB, LANE),
        pad2(p["wah"], _round_up(h2, SUB), LANE),
        pad2(p["bah"], SUB, LANE),
        pad2(w_heads, _round_up(h2, SUB), LANE),
        pad2(b_heads, SUB, LANE),
    ]
    offs, r = [], 0
    for blk in blocks:
        offs.append(r)
        r += blk.shape[0]
    slab = jnp.concatenate(blocks, axis=0)            # (424, 128) for the demo
    meta = dict(
        offs=tuple(offs),
        rows=tuple(b.shape[0] for b in blocks),
        state_dim=state_dim,
        in_rows=in_rows,
        action_num=action_num,
    )
    return slab, meta


def _make_kernel(meta):
    o = meta["offs"]
    rows = meta["rows"]
    action_num = meta["action_num"]

    def kernel(x_ref, slab_ref, out_ref):
        x = x_ref[...]                                   # (B, in_rows), padded cols hit zero w1 rows

        def w(i):
            return slab_ref[o[i]:o[i] + rows[i], :]      # static slice -> zero-cost view

        def b(i):
            return slab_ref[o[i]:o[i] + 1, :]            # (1, 128), broadcasts over batch

        # affine_layers[0] + tanh  (zero-padded MXU matmul; padding contributes 0)
        h = jnp.tanh(jnp.dot(x, w(0), preferred_element_type=jnp.float32) + b(1))
        # affine_layers[1] + tanh
        h = jnp.tanh(jnp.dot(h, w(2), preferred_element_type=jnp.float32) + b(3))
        # action_hidden (== value_hidden in the original forward); padded lanes -> tanh(0) = 0
        ah = jnp.tanh(jnp.dot(h, w(4), preferred_element_type=jnp.float32) + b(5))
        # fused heads: lanes [0, action_num) = action logits, lane action_num = value pre-act
        heads = jnp.dot(ah, w(6), preferred_element_type=jnp.float32) + b(7)   # (B, 128)

        # Masked, numerically stable softmax over the action lanes; no lane
        # slicing / concatenation — everything stays in one (B, 128) vreg.
        lane = jax.lax.broadcasted_iota(jnp.int32, heads.shape, 1)
        amask = lane < action_num
        masked = jnp.where(amask, heads, jnp.float32(-1e30))
        m = jnp.max(masked, axis=1, keepdims=True)
        e = jnp.exp(masked - m)                          # underflows to 0 on masked lanes
        denom = jnp.sum(e, axis=1, keepdims=True)
        probs = e / denom                                # exact division (sums to 1)

        # Single lane-dense store: probs on action lanes, tanh(value) on lane
        # action_num, tanh(0)=0 on the remaining padded lanes.
        out_ref[...] = jnp.where(amask, probs, jnp.tanh(heads))

    return kernel


def agent_disc_forward(x, slab, meta):
    B = x.shape[0]
    action_num = meta["action_num"]
    state_dim = meta["state_dim"]
    in_rows = meta["in_rows"]

    x_pad = x if in_rows == state_dim else jnp.pad(x, ((0, 0), (0, in_rows - state_dim)))

    vmem = pl.BlockSpec(memory_space=pltpu.MemorySpace.VMEM)
    # No grid: whole problem (~210 KiB weights + a (B,128) activation) fits
    # VMEM on every TPU generation; a grid would only add per-step overhead.
    out = pl.pallas_call(
        _make_kernel(meta),
        out_shape=jax.ShapeDtypeStruct((B, LANE), jnp.float32),
        in_specs=[vmem, vmem],
        out_specs=vmem,
    )(x_pad, slab)

    action_prob = out[:, :action_num]
    value = out[:, action_num:action_num + 1]
    return action_prob, value


def init_params(key, state_dim, action_num, hidden_size=(128, 128)):
    """Deterministic synthetic initialization (shapes match the nn.Linear layers)."""
    h1, h2 = hidden_size
    nh = h2 // 8  # value_hidden_num == action_hidden_num == 16 for hidden 128

    ks = jax.random.split(key, 12)

    def lin(kw, kb, fan_in, fan_out):
        # weights stored as (in, out) == PyTorch weight.T
        w = 0.1 * jax.random.normal(kw, (fan_in, fan_out), dtype=jnp.float32)
        bb = 0.1 * jax.random.normal(kb, (1, fan_out), dtype=jnp.float32)
        return w, bb

    w1, b1 = lin(ks[0], ks[1], state_dim, h1)
    w2, b2 = lin(ks[2], ks[3], h1, h2)
    wah, bah = lin(ks[4], ks[5], h2, nh)
    # value_hidden layer exists in the module but is unused in forward
    # (original quirk); kept only for shape fidelity.
    wvh, bvh = lin(ks[6], ks[7], h2, nh)
    wao, bao = lin(ks[8], ks[9], nh, action_num)
    wvo, bvo = lin(ks[10], ks[11], nh, 1)

    return dict(
        w1=w1, b1=b1, w2=w2, b2=b2,
        wah=wah, bah=bah, wvh=wvh, bvh=bvh,
        wao=wao, bao=bao, wvo=wvo, bvo=bvo,
    )


def reference_forward(x, p):
    """Pure-JAX reference mirroring the PyTorch forward exactly."""
    h = jnp.tanh(x @ p["w1"] + p["b1"])
    h = jnp.tanh(h @ p["w2"] + p["b2"])
    ah = jnp.tanh(h @ p["wah"] + p["bah"])
    vh = jnp.tanh(h @ p["wah"] + p["bah"])  # reuses action_hidden, as in the module
    logits = ah @ p["wao"] + p["bao"]
    action_prob = jax.nn.softmax(logits, axis=1)
    value = jnp.tanh(vh @ p["wvo"] + p["bvo"])
    return action_prob, value


if __name__ == "__main__":
    # MountainCar-like setup: state_dim=2, action_num=3, hidden=(128,128)
    B, state_dim, action_num = 8, 2, 3

    key = jax.random.PRNGKey(0)
    kx, kp = jax.random.split(key)
    x = jax.random.normal(kx, (B, state_dim), dtype=jnp.float32)
    params = init_params(kp, state_dim, action_num)
    slab, meta = pack_params(params)   # one-time lane-dense packing of all weights

    action_prob, value = agent_disc_forward(x, slab, meta)
    jax.block_until_ready((action_prob, value))

    ref_ap, ref_v = reference_forward(x, params)
    assert action_prob.shape == (B, action_num)
    assert value.shape == (B, 1)
    assert jnp.allclose(action_prob, ref_ap, atol=1e-5, rtol=1e-4)
    assert jnp.allclose(value, ref_v, atol=1e-5, rtol=1e-4)
    assert jnp.allclose(jnp.sum(action_prob, axis=1), 1.0, atol=1e-5)

    print("KERNEL_OK")
</pallas_src>

<mosaic_0001>
module attributes {stable_mosaic.version = 11 : i64} {
  func.func @kernel(%arg0: memref<8x8xf32, #tpu.memory_space<vmem>>, %arg1: memref<424x128xf32, #tpu.memory_space<vmem>>, %arg2: memref<8x128xf32, #tpu.memory_space<vmem>>) attributes {dimension_semantics = [], scalar_prefetch = 0 : i64, scratch_operands = 0 : i64, tpu.core_type = #tpu.core_type<tc>} {
    %c0 = arith.constant 0 : index
    %c0_0 = arith.constant 0 : index
    %0 = vector.load %arg0[%c0, %c0_0] : memref<8x8xf32, #tpu.memory_space<vmem>>, vector<8x8xf32>
    %c0_1 = arith.constant 0 : index
    %c0_2 = arith.constant 0 : index
    %1 = vector.load %arg1[%c0_1, %c0_2] : memref<424x128xf32, #tpu.memory_space<vmem>>, vector<8x128xf32>
    %cst = arith.constant dense<0.000000e+00> : vector<8x128xf32>
    %2 = tpu.matmul %0, %1, %cst {dimension_numbers = #tpu.dot_dimension_numbers<[1], [0], [0], [1], [0, 0, 1, 1], [], []>} : vector<8x8xf32>, vector<8x128xf32>, vector<8x128xf32> -> vector<8x128xf32>
    %c8 = arith.constant 8 : index
    %c0_3 = arith.constant 0 : index
    %3 = vector.load %arg1[%c8, %c0_3] : memref<424x128xf32, #tpu.memory_space<vmem>>, vector<1x128xf32>
    %4 = vector.broadcast %3 : vector<1x128xf32> to vector<8x128xf32>
    %5 = arith.addf %2, %4 : vector<8x128xf32>
    %6 = math.tanh %5 : vector<8x128xf32>
    %c16 = arith.constant 16 : index
    %c0_4 = arith.constant 0 : index
    %7 = vector.load %arg1[%c16, %c0_4] : memref<424x128xf32, #tpu.memory_space<vmem>>, vector<128x128xf32>
    %cst_5 = arith.constant dense<0.000000e+00> : vector<8x128xf32>
    %8 = tpu.matmul %6, %7, %cst_5 {dimension_numbers = #tpu.dot_dimension_numbers<[1], [0], [0], [1], [0, 0, 1, 1], [], []>} : vector<8x128xf32>, vector<128x128xf32>, vector<8x128xf32> -> vector<8x128xf32>
    %c144 = arith.constant 144 : index
    %c0_6 = arith.constant 0 : index
    %9 = vector.load %arg1[%c144, %c0_6] : memref<424x128xf32, #tpu.memory_space<vmem>>, vector<1x128xf32>
    %10 = vector.broadcast %9 : vector<1x128xf32> to vector<8x128xf32>
    %11 = arith.addf %8, %10 : vector<8x128xf32>
    %12 = math.tanh %11 : vector<8x128xf32>
    %c152 = arith.constant 152 : index
    %c0_7 = arith.constant 0 : index
    %13 = vector.load %arg1[%c152, %c0_7] : memref<424x128xf32, #tpu.memory_space<vmem>>, vector<128x128xf32>
    %cst_8 = arith.constant dense<0.000000e+00> : vector<8x128xf32>
    %14 = tpu.matmul %12, %13, %cst_8 {dimension_numbers = #tpu.dot_dimension_numbers<[1], [0], [0], [1], [0, 0, 1, 1], [], []>} : vector<8x128xf32>, vector<128x128xf32>, vector<8x128xf32> -> vector<8x128xf32>
    %c280 = arith.constant 280 : index
    %c0_9 = arith.constant 0 : index
    %15 = vector.load %arg1[%c280, %c0_9] : memref<424x128xf32, #tpu.memory_space<vmem>>, vector<1x128xf32>
    %16 = vector.broadcast %15 : vector<1x128xf32> to vector<8x128xf32>
    %17 = arith.addf %14, %16 : vector<8x128xf32>
    %18 = math.tanh %17 : vector<8x128xf32>
    %c288 = arith.constant 288 : index
    %c0_10 = arith.constant 0 : index
    %19 = vector.load %arg1[%c288, %c0_10] : memref<424x128xf32, #tpu.memory_space<vmem>>, vector<128x128xf32>
    %cst_11 = arith.constant dense<0.000000e+00> : vector<8x128xf32>
    %20 = tpu.matmul %18, %19, %cst_11 {dimension_numbers = #tpu.dot_dimension_numbers<[1], [0], [0], [1], [0, 0, 1, 1], [], []>} : vector<8x128xf32>, vector<128x128xf32>, vector<8x128xf32> -> vector<8x128xf32>
    %c416 = arith.constant 416 : index
    %c0_12 = arith.constant 0 : index
    %21 = vector.load %arg1[%c416, %c0_12] : memref<424x128xf32, #tpu.memory_space<vmem>>, vector<1x128xf32>
    %22 = vector.broadcast %21 : vector<1x128xf32> to vector<8x128xf32>
    %23 = arith.addf %20, %22 : vector<8x128xf32>
    %24 = tpu.iota {dimensions = array<i32: 1>} : vector<8x128xi32>
    %c3_i32 = arith.constant 3 : i32
    %25 = vector.broadcast %c3_i32 : i32 to vector<8x128xi32>
    %26 = arith.cmpi slt, %24, %25 : vector<8x128xi32>
    %cst_13 = arith.constant -1.000000e+30 : f32
    %27 = vector.broadcast %cst_13 : f32 to vector<8x128xf32>
    %28 = arith.select %26, %23, %27 : vector<8x128xi1>, vector<8x128xf32>
    %cst_14 = arith.constant dense<0xFF800000> : vector<8xf32>
    %29 = vector.multi_reduction <maximumf>, %28, %cst_14 [1] : vector<8x128xf32> to vector<8xf32>
    %30 = vector.shape_cast %29 : vector<8xf32> to vector<8x1xf32>
    %31 = vector.broadcast %30 : vector<8x1xf32> to vector<8x128xf32>
    %32 = arith.subf %28, %31 : vector<8x128xf32>
    %33 = math.exp %32 : vector<8x128xf32>
    %cst_15 = arith.constant dense<0.000000e+00> : vector<8xf32>
    %34 = vector.multi_reduction <add>, %33, %cst_15 [1] : vector<8x128xf32> to vector<8xf32>
    %35 = vector.shape_cast %34 : vector<8xf32> to vector<8x1xf32>
    %36 = vector.broadcast %35 : vector<8x1xf32> to vector<8x128xf32>
    %37 = arith.divf %33, %36 : vector<8x128xf32>
    %38 = math.tanh %23 : vector<8x128xf32>
    %39 = arith.select %26, %37, %38 : vector<8x128xi1>, vector<8x128xf32>
    %c0_16 = arith.constant 0 : index
    %c0_17 = arith.constant 0 : index
    %40 = vector.load %arg2[%c0_16, %c0_17] : memref<8x128xf32, #tpu.memory_space<vmem>>, vector<8x128xf32>
    tpu.vector_store %arg2[%c0_16, %c0_17], %39 {strides = array<i32>} : memref<8x128xf32, #tpu.memory_space<vmem>>, vector<8x128xf32>,
    return
  }
}

</mosaic_0001>

<bundles_post_ra>
// kernel: tpu_custom_call.1
= control target key start
LH: loop header
LB: loop body
LE: loop exit
PB: predicated region body
PF: predicated region fallthrough
CT: control target
= control target key end

     0   :  { %7 = vsyncpa [#allocation3], 0  ;;  %s860_s0 = inlined_call_operand.hbm [shape: f32[8,8], index: 0, kind: input, shape index: {}]   ;;  %s861_s1 = inlined_call_operand.hbm [shape: f32[424,128], index: 1, kind: input, shape index: {}]   ;;  %s862_s2 = inlined_call_operand.hbm [shape: f32[8,128], index: 2, kind: output, shape index: {}]  }
   0x1   :  { %8 = vsyncpa [#allocation6], 0 }
   0x2   :  { %9 = vsyncpa [#allocation4], 0  ;;  %s759_s9 = smov [#allocation2]   ;;  %s760_s11 = smov [#allocation5]  }
   0x3   :  { %s16_s10 = sshll.u32 %s759_s9, 4  ;;  %s25_s12 = sshll.u32 %s760_s11, 4  ;;  %s17_s10 = int_to_ptr.vmem [resolvable:$true] %s16_s10  ;;  %s782_s12 = int_to_ptr.vmem [resolvable:$true] %s25_s12 }
   0x4   :  { %s687_s15 = scalar_lea.hbm %s860_s0, 128 }
   0x5   :  { %p688_p0 = scmp.ne.s32.totalorder %s860_s0, %s687_s15  ;;  %p691_p1 = scmp.lt.u32.totalorder %s687_s15, %s860_s0 }
   0x7   :  { %p693_p2 = pnand %p691_p1, %p688_p0 }
   0x9   :  { %696 = shalt.err (!%p693_p2)
}
   0xa   :  { %s697_s20 = scalar_lea.vmem %s17_s10, 128  ;;  %p702_p4 = scmp.lt.s32.totalorder %s17_s10, %s17_s10 }
   0xb   :  { %p698_p3 = scmp.ne.s32.totalorder %s17_s10, %s697_s20  ;;  %p703_p5 = scmp.lt.s32.totalorder %s697_s20, %s697_s20 }
   0xd   :  { %p704_p6 = por %p703_p5, %p702_p4 }
   0xf   :  { %p705_p7 = pnand %p704_p6, %p698_p3 }
  0x11   :  { %708 = shalt.err (!%p705_p7)
}
  0x12   :  { %19 = dma.hbm_to_vmem [thread:$0]  %s860_s0, 128, %s17_s10, [#allocation3]  }
  0x13   :  { %s709_s25 = scalar_lea.hbm %s861_s1, 6784 }
  0x14   :  { %p710_p8 = scmp.ne.s32.totalorder %s861_s1, %s709_s25  ;;  %p713_p9 = scmp.lt.u32.totalorder %s709_s25, %s861_s1 }
  0x16   :  { %p715_p10 = pnand %p713_p9, %p710_p8 }
  0x18   :  { %718 = shalt.err (!%p715_p10)
}
  0x19   :  { %s719_s30 = scalar_lea.vmem %s782_s12, 6784  ;;  %p724_p12 = scmp.lt.s32.totalorder %s782_s12, %s782_s12 }
  0x1a   :  { %p720_p11 = scmp.ne.s32.totalorder %s782_s12, %s719_s30  ;;  %p725_p13 = scmp.lt.s32.totalorder %s719_s30, %s719_s30 }
  0x1c   :  { %p726_p0 = por %p725_p13, %p724_p12 }
  0x1e   :  { %p727_p1 = pnand %p726_p0, %p720_p11 }
  0x20   :  { %730 = shalt.err (!%p727_p1)
}
  0x21   :  { %s761_s0 = smov 128   ;;  %s762_s3 = smov 8  }
  0x22   :  { %31 = dma.hbm_to_vmem [thread:$0]  %s861_s1, 6784, %s782_s12, [#allocation6], %s761_s0, %s761_s0, %s762_s3  }
  0x23   :  { %753 = dma.done.wait [#allocation3], 128  }
  0x24   :  { %754 = vsyncadd [#allocation3], 4294967168 }
  0x25   :  { %755 = dma.done.wait [#allocation6], 6784  }
  0x26   :  { %756 = vsyncadd [#allocation6], 4294960512  ;;  %v763_v0 = vmov 0.0   ;;  %vm764_vm0 = vmmov 0   ;;  %v765_v1 = vmov 0.0|0.0   ;;  %vm45_vm1 = vcmask 64512  }
  0x27   :  { %485 = vmatprep.subr.mxu0 %v763_v0  ;;  %487 = vmatprep.mubr.msk.f32.mxu0 %vm764_vm0, %v763_v0  ;;  %v39_v2 = vld [vmem:[#allocation5] sm:$0xff]  ;;  %v38_v3 = vld [vmem:[#allocation2] sm:$0xff]  ;;  %v120_v4 = vld [vmem:[#allocation5 + $0x10] sm:$0xff]  ;;  %s766_s1 = smov [#allocation7]  }
  0x28   :  { %595 = vmatprep.subr.bf16.mxu1 %v765_v1  ;;  %522 = vmatprep.mubr.msk.f32.mxu1 %vm764_vm0, %v763_v0  ;;  %v121_v5 = vld [vmem:[#allocation5 + $0x18] sm:$0xff]  ;;  %v122_v6 = vld [vmem:[#allocation5 + $0x20] sm:$0xff]  ;;  %v123_v7 = vld [vmem:[#allocation5 + $0x28] sm:$0xff]  ;;  %s417_s6 = sshll.u32 %s766_s1, 4  ;;  %s418_s6 = int_to_ptr.vmem [resolvable:$true] %s417_s6 }
  0x29   :  { %486 = vmatpush3.msra.mxu0 %v39_v2  ;;  %v596_v8 = vpack.c.bf16 %v121_v5, %v120_v4  ;;  %v599_v9 = vpack.c.bf16 %v123_v7, %v122_v6  ;;  %v124_v10 = vld [vmem:[#allocation5 + $0x30] sm:$0xff]  ;;  %v125_v11 = vld [vmem:[#allocation5 + $0x38] sm:$0xff]  ;;  %v126_v13 = vld [vmem:[#allocation5 + $0x40] sm:$0xff]  ;;  %s731_s7 = scalar_lea.vmem %s418_s6, 128  ;;  %p736_p3 = scmp.lt.s32.totalorder %s418_s6, %s418_s6 }
  0x2a   :  { %488 = vmatmul.mubr.msk.f32.vlgmr.msra.gmra.mrb[0].mxu0 %vm45_vm1, %v38_v3  ;;  %619 = vmatprep.subr.bf16.mxu0 %v765_v1  ;;  %v602_v12 = vpack.c.bf16 %v125_v11, %v124_v10  ;;  %v127_v14 = vld [vmem:[#allocation5 + $0x48] sm:$0xff]  ;;  %v128_v16 = vld [vmem:[#allocation5 + $0x50] sm:$0xff]  ;;  %v129_v17 = vld [vmem:[#allocation5 + $0x58] sm:$0xff]  ;;  %p732_p2 = scmp.ne.s32.totalorder %s418_s6, %s731_s7  ;;  %p737_p4 = scmp.lt.s32.totalorder %s731_s7, %s731_s7 }
  0x2b   :  { %557 = vmatprep.mubr.msk.f32.mxu0 %vm764_vm0, %v763_v0  ;;  %597 = vmatpush3.bf16.msra.mxu1 %v596_v8  ;;  %v605_v15 = vpack.c.bf16 %v127_v14, %v126_v13  ;;  %v608_v18 = vpack.c.bf16 %v129_v17, %v128_v16  ;;  %v130_v19 = vld [vmem:[#allocation5 + $0x60] sm:$0xff]  ;;  %v131_v20 = vld [vmem:[#allocation5 + $0x68] sm:$0xff]  ;;  %v132_v22 = vld [vmem:[#allocation5 + $0x70] sm:$0xff] }
  0x2c   :  { %598 = vmatprep.subr.bf16.mxu1 %v765_v1  ;;  %v611_v21 = vpack.c.bf16 %v131_v20, %v130_v19  ;;  %v133_v23 = vld [vmem:[#allocation5 + $0x78] sm:$0xff]  ;;  %v134_v25 = vld [vmem:[#allocation5 + $0x80] sm:$0xff]  ;;  %v135_v26 = vld [vmem:[#allocation5 + $0x88] sm:$0xff]  ;;  %p738_p5 = por %p737_p4, %p736_p3 }
  0x2d   :  { %v614_v24 = vpack.c.bf16 %v133_v23, %v132_v22  ;;  %v617_v27 = vpack.c.bf16 %v135_v26, %v134_v25  ;;  %v212_v28 = vld [vmem:[#allocation5 + $0x98] sm:$0xff]  ;;  %v213_v29 = vld [vmem:[#allocation5 + $0xa0] sm:$0xff]  ;;  %v214_v30 = vld [vmem:[#allocation5 + $0xa8] sm:$0xff] }
  0x2e   :  { %v620_v31 = vpack.c.bf16 %v213_v29, %v212_v28  ;;  %v215_v32 = vld [vmem:[#allocation5 + $0xb0] sm:$0xff]  ;;  %v216_v34 = vld [vmem:[#allocation5 + $0xb8] sm:$0xff]  ;;  %v217_v35 = vld [vmem:[#allocation5 + $0xc0] sm:$0xff]  ;;  %v395_v28 = vlaneseq  ;;  %p739_p6 = pnand %p738_p5, %p732_p2 }
  0x2f   :  { %600 = vmatpush3.bf16.msra.mxu1 %v599_v9  ;;  %v623_v33 = vpack.c.bf16 %v215_v32, %v214_v30  ;;  %v626_v36 = vpack.c.bf16 %v217_v35, %v216_v34  ;;  %v218_v37 = vld [vmem:[#allocation5 + $0xc8] sm:$0xff]  ;;  %v219_v38 = vld [vmem:[#allocation5 + $0xd0] sm:$0xff]  ;;  %v220_v40 = vld [vmem:[#allocation5 + $0xd8] sm:$0xff] }
  0x30   :  { %601 = vmatprep.subr.bf16.mxu1 %v765_v1  ;;  %621 = vmatpush3.bf16.msra.mxu0 %v620_v31  ;;  %v629_v39 = vpack.c.bf16 %v219_v38, %v218_v37  ;;  %v221_v41 = vld [vmem:[#allocation5 + $0xe0] sm:$0xff]  ;;  %v427_v43 = vld [vmem:[#allocation5 + $0x8] ss:$0 sm:$0xff]  ;;  %v223_v49 = vld [vmem:[#allocation5 + $0xf0] sm:$0xff]  ;;  %v396_v29 = vand.u32 127, %v395_v28 }
  0x31   :  { %622 = vmatprep.subr.bf16.mxu0 %v765_v1  ;;  %v632_v42 = vpack.c.bf16 %v221_v41, %v220_v40  ;;  %v222_v48 = vld [vmem:[#allocation5 + $0xe8] sm:$0xff]  ;;  %v224_v51 = vld [vmem:[#allocation5 + $0xf8] sm:$0xff]  ;;  %v225_v52 = vld [vmem:[#allocation5 + $0x100] sm:$0xff] }
  0x32   :  { %v635_v50 = vpack.c.bf16 %v223_v49, %v222_v48  ;;  %v638_v53 = vpack.c.bf16 %v225_v52, %v224_v51  ;;  %v226_v54 = vld [vmem:[#allocation5 + $0x108] sm:$0xff]  ;;  %v227_v55 = vld [vmem:[#allocation5 + $0x110] sm:$0xff]  ;;  %v304_v57 = vld [vmem:[#allocation5 + $0x120] sm:$0xff]  ;;  %vm397_vm2 = vcmp.lt.s32.totalorder %v396_v29, 3 }
  0x33   :  { %603 = vmatpush3.bf16.msra.mxu1 %v602_v12  ;;  %v641_v56 = vpack.c.bf16 %v227_v55, %v226_v54  ;;  %v305_v58 = vld [vmem:[#allocation5 + $0x128] sm:$0xff]  ;;  %v306_v59 = vld [vmem:[#allocation5 + $0x130] sm:$0xff]  ;;  %v307_v61 = vld [vmem:[#allocation5 + $0x138] sm:$0xff] }
  0x34   :  { %604 = vmatprep.subr.bf16.mxu1 %v765_v1  ;;  %624 = vmatpush3.bf16.msra.mxu0 %v623_v33  ;;  %v644_v60 = vpack.c.bf16 %v305_v58, %v304_v57  ;;  %v647_v62 = vpack.c.bf16 %v307_v61, %v306_v59  ;;  %v308_v63 = vld [vmem:[#allocation5 + $0x140] sm:$0xff]  ;;  %v310_v3 = vld [vmem:[#allocation5 + $0x150] sm:$0xff]  ;;  %v311_v4 = vld [vmem:[#allocation5 + $0x158] sm:$0xff] }
  0x35   :  { %625 = vmatprep.subr.bf16.mxu0 %v765_v1  ;;  %v653_v5 = vpack.c.bf16 %v311_v4, %v310_v3  ;;  %v312_v6 = vld [vmem:[#allocation5 + $0x160] sm:$0xff]  ;;  %v313_v7 = vld [vmem:[#allocation5 + $0x168] sm:$0xff]  ;;  %v429_v9 = vld [vmem:[#allocation5 + $0x90] ss:$0 sm:$0xff] }
  0x36   :  { %v656_v8 = vpack.c.bf16 %v313_v7, %v312_v6  ;;  %v314_v14 = vld [vmem:[#allocation5 + $0x170] sm:$0xff]  ;;  %v316_v17 = vld [vmem:[#allocation5 + $0x180] sm:$0xff]  ;;  %v430_v23 = vld [vmem:[#allocation5 + $0x118] ss:$0 sm:$0xff] }
  0x37   :  { %606 = vmatpush3.bf16.msra.mxu1 %v605_v15  ;;  %v315_v15 = vld [vmem:[#allocation5 + $0x178] sm:$0xff]  ;;  %v318_v20 = vld [vmem:[#allocation5 + $0x190] sm:$0xff]  ;;  %v431_v30 = vld [vmem:[#allocation5 + $0x1a0] ss:$0 sm:$0xff] }
  0x38   :  { %607 = vmatprep.subr.bf16.mxu1 %v765_v1  ;;  %627 = vmatpush3.bf16.msra.mxu0 %v626_v36  ;;  %v659_v16 = vpack.c.bf16 %v315_v15, %v314_v14 }
  0x39   :  { %628 = vmatprep.subr.bf16.mxu0 %v765_v1 }
  0x3b   :  { %609 = vmatpush3.bf16.msra.mxu1 %v608_v18  ;;  %v317_v18 = vld [vmem:[#allocation5 + $0x188] sm:$0xff] }
  0x3c   :  { %610 = vmatprep.subr.bf16.mxu1 %v765_v1  ;;  %630 = vmatpush3.bf16.msra.mxu0 %v629_v39  ;;  %v662_v19 = vpack.c.bf16 %v317_v18, %v316_v17 }
  0x3d   :  { %631 = vmatprep.subr.bf16.mxu0 %v765_v1 }
  0x3f   :  { %612 = vmatpush3.bf16.msra.mxu1 %v611_v21  ;;  %v319_v21 = vld [vmem:[#allocation5 + $0x198] sm:$0xff] }
  0x40   :  { %613 = vmatprep.subr.bf16.mxu1 %v765_v1  ;;  %633 = vmatpush3.bf16.msra.mxu0 %v632_v42  ;;  %v665_v22 = vpack.c.bf16 %v319_v21, %v318_v20 }
  0x41   :  { %634 = vmatprep.subr.bf16.mxu0 %v765_v1 }
  0x43   :  { %615 = vmatpush3.bf16.msra.mxu1 %v614_v24 }
  0x44   :  { %616 = vmatprep.subr.bf16.mxu1 %v765_v1  ;;  %636 = vmatpush3.bf16.msra.mxu0 %v635_v50 }
  0x45   :  { %637 = vmatprep.subr.bf16.mxu0 %v765_v1 }
  0x47   :  { %618 = vmatpush3.bf16.msra.mxu1 %v617_v27 }
  0x48   :  { %643 = vmatprep.subr.bf16.mxu1 %v765_v1  ;;  %639 = vmatpush3.bf16.msra.mxu0 %v638_v53 }
  0x49   :  { %640 = vmatprep.subr.bf16.mxu0 %v765_v1 }
  0x4c   :  { %642 = vmatpush3.bf16.msra.mxu0 %v641_v56 }
  0xfd   :  { %v115_v44 = vpop.f32.mrb[0].mxu0 }
  0xfe   :  { %v116_v45 = vadd.f32 %v427_v43, %v115_v44  ;;  %v489_v46 = vpop.f32.mrb[1].mxu0 }
 0x100   :  { %675 = vtanh.f32 %v116_v45 }
 0x10a   :  { %v676_v47 = vpop.eup %675 }
 0x10b   :  { %523 = vmatmul.mubr.f32.vlgmr.msra.gmra.mrb[0].mxu1 %v676_v47 }
 0x10c   :  { %592 = vmatprep.mubr.msk.f32.mxu1 %vm764_vm0, %v763_v0  ;;  %645 = vmatpush3.bf16.msra.mxu1 %v644_v60  ;;  %v309_v0 = vld [vmem:[#allocation5 + $0x148] sm:$0xff] }
 0x10d   :  { %646 = vmatprep.subr.bf16.mxu1 %v765_v1  ;;  %v650_v2 = vpack.c.bf16 %v309_v0, %v308_v63 }
 0x110   :  { %648 = vmatpush3.bf16.msra.mxu1 %v647_v62 }
 0x111   :  { %649 = vmatprep.subr.bf16.mxu1 %v765_v1 }
 0x114   :  { %651 = vmatpush3.bf16.msra.mxu1 %v650_v2 }
 0x115   :  { %652 = vmatprep.subr.bf16.mxu1 %v765_v1 }
 0x118   :  { %654 = vmatpush3.bf16.msra.mxu1 %v653_v5 }
 0x119   :  { %655 = vmatprep.subr.bf16.mxu1 %v765_v1 }
 0x11c   :  { %657 = vmatpush3.bf16.msra.mxu1 %v656_v8 }
 0x11d   :  { %658 = vmatprep.subr.bf16.mxu1 %v765_v1 }
 0x120   :  { %660 = vmatpush3.bf16.msra.mxu1 %v659_v16 }
 0x121   :  { %661 = vmatprep.subr.bf16.mxu1 %v765_v1 }
 0x124   :  { %663 = vmatpush3.bf16.msra.mxu1 %v662_v19 }
 0x125   :  { %664 = vmatprep.subr.bf16.mxu1 %v765_v1 }
 0x128   :  { %666 = vmatpush3.bf16.msra.mxu1 %v665_v22 }
 0x1de   :  { %v207_v10 = vpop.f32.mrb[0].mxu1 }
 0x1df   :  { %v208_v11 = vadd.f32 %v429_v9, %v207_v10  ;;  %v524_v12 = vpop.f32.mrb[1].mxu1 }
 0x1e1   :  { %677 = vtanh.f32 %v208_v11 }
 0x1eb   :  { %v678_v13 = vpop.eup %677 }
 0x1ec   :  { %558 = vmatmul.mubr.f32.vlgmr.msra.gmra.mrb[2].mxu0 %v678_v13 }
 0x2bf   :  { %v299_v24 = vpop.f32.mrb[2].mxu0 }
 0x2c0   :  { %v300_v25 = vadd.f32 %v430_v23, %v299_v24  ;;  %v559_v26 = vpop.f32.mrb[3].mxu0 }
 0x2c2   :  { %679 = vtanh.f32 %v300_v25 }
 0x2cc   :  { %v680_v27 = vpop.eup %679 }
 0x2cd   :  { %593 = vmatmul.mubr.f32.vlgmr.msra.gmra.mrb[2].mxu1 %v680_v27 }
 0x3a0   :  { %v391_v31 = vpop.f32.mrb[2].mxu1 }
 0x3a1   :  { %v392_v32 = vadd.f32 %v431_v30, %v391_v31  ;;  %v594_v33 = vpop.f32.mrb[3].mxu1 }
 0x3a3   :  { %v398_v34 = vsel %vm397_vm2, %v392_v32, -1e+30 }
 0x3a4   :  { %399 = vmax.xlane.f32.xlu0 %v398_v34 }
 0x431   :  { %v400_v35 = vpop.xlane.xlu0 %399 }
 0x432   :  { %v401_v1 = vsub.f32 %v398_v34, %v400_v35 }
 0x434   :  { %v402_v36 = vmul.f32 1.442695, %v401_v1 }
 0x436   :  { %681 = vpow2.f32 %v402_v36 }
 0x440   :  { %v682_v37 = vpop.eup %681 }
 0x441   :  { %404 = vadd.xlane.f32.xlu0 %v682_v37 }
 0x4ce   :  { %v405_v38 = vpop.xlane.xlu0 %404 }
 0x4cf   :  { %683 = vrcp.f32 %v405_v38 }
 0x4d0   :  { %685 = vtanh.f32 %v392_v32 }
 0x4d9   :  { %v684_v39 = vpop.eup %683 }
 0x4da   :  { %v407_v40 = vmul.f32 %v684_v39, %v682_v37  ;;  %v686_v41 = vpop.eup %685 }
 0x4dc   :  { %v409_v42 = vsel %vm397_vm2, %v407_v40, %v686_v41 }
 0x4dd   :  { %410 = vst [vmem:[#allocation7] sm:$0xff] %v409_v42 }
 0x4de   :  { %742 = shalt.err (!%p739_p6)
}
 0x4df   :  { %s743_s10 = scalar_lea.hbm %s862_s2, 128 }
 0x4e0   :  { %p744_p7 = scmp.ne.s32.totalorder %s862_s2, %s743_s10  ;;  %p747_p8 = scmp.lt.u32.totalorder %s743_s10, %s862_s2 }
 0x4e2   :  { %p749_p9 = pnand %p747_p8, %p744_p7 }
 0x4e4   :  { %752 = shalt.err (!%p749_p9)
}
 0x4e5   :  { %420 = dma.vmem_to_hbm [thread:$0]  %s418_s6, 128, %s862_s2, [#allocation4]  }
 0x4e6   :  { %757 = dma.done.wait [#allocation4], 128  }
 0x4e7   :  { %758 = vsyncadd [#allocation4], 4294967168 }
 0x4e8   :  { %424 = vsyncpa [#allocation3], 1 }
 0x4e9   :  { %425 = vsyncpa [#allocation6], 1 }
 0x4ea   :  { %426 = vsyncpa [#allocation4], 1 }

</bundles_post_ra>
